<compile_context>
chip_gen: v5e
topology: v5e:2x2
jax: 0.10.0
libtpu: 0.0.40
codegen_flags: <defaults>
</compile_context>

<pallas_src>
import functools

import jax
import jax.numpy as jnp
from jax.experimental import pallas as pl
from jax.experimental.pallas import tpu as pltpu


def _round_up(n, m):
    return ((n + m - 1) // m) * m


def _pad2(a, rows, cols):
    a = a.astype(jnp.float32)
    return jnp.pad(a, ((0, rows - a.shape[0]), (0, cols - a.shape[1])))


def _transition_kernel(min_sigma, max_sigma, hidden_dim, out_dim,
                       xa_ref, wfc_ref, bfc_ref, g_ref, b_ref,
                       wh_ref, bh_ref, out_ref):
    # Single fused fc matmul (activation already packed [x | action] and bf16 in the wrapper).
    h = jnp.dot(xa_ref[...], wfc_ref[...], preferred_element_type=jnp.float32) + bfc_ref[...]

    # LayerNorm (eps=1e-5, biased variance == torch.nn.LayerNorm), two-pass stats in f32.
    # Hidden lanes >= hidden_dim are exactly zero (zero-padded weights/bias), so the plain lane
    # sum gives the true sum; after centering, the padded lanes would hold -mean, so mask them
    # before the sum-of-squares.  Zero-padded gamma/beta re-zero those lanes for the head matmul.
    # NOTE: rows past the true batch in a partial last block see unspecified (finite) data; they
    # are row-independent here and masked off by the partial store, so they never affect results.
    inv_h = 1.0 / float(hidden_dim)
    lane = jax.lax.broadcasted_iota(jnp.int32, h.shape, 1)
    mean = jnp.sum(h, axis=-1, keepdims=True) * inv_h
    d = jnp.where(lane < hidden_dim, h - mean, 0.0)
    var = jnp.sum(d * d, axis=-1, keepdims=True) * inv_h
    hn = d * jax.lax.rsqrt(var + 1e-5)
    hn = jnp.maximum(hn * g_ref[...] + b_ref[...], 0.0)          # affine + ReLU

    # Fused [mu | sigma] head: single lane-dense matmul + single (tb, P) store.
    raw = (jnp.dot(hn.astype(wh_ref.dtype), wh_ref[...],
                   preferred_element_type=jnp.float32) + bh_ref[...])

    # sigmoid(x) = 0.5*(tanh(0.5*x)+1): one EUP op, exactly bounded in [0, 1] -> no clip needed,
    # and the affine below stays exactly inside [min_sigma, max_sigma] in f32.
    sig = 0.5 * (jnp.tanh(0.5 * raw) + 1.0)
    sigma = min_sigma + (max_sigma - min_sigma) * sig

    # Columns [0, out_dim) are mu (no normalize: max_norm=None); the rest get the sigma
    # transform (padding columns are garbage but are sliced off in the wrapper).
    col = jax.lax.broadcasted_iota(jnp.int32, raw.shape, 1)
    out_ref[...] = jnp.where(col < out_dim, raw, sigma).astype(out_ref.dtype)


def probabilistic_transition_forward(x, action, params,
                                     max_sigma=10.0, min_sigma=1e-4,
                                     block_b=2048, use_bf16=True,
                                     out_dtype=jnp.bfloat16):
    """x: (B, out_dim), action: (B, action_dim) -> (mu, sigma), each (B, out_dim) in out_dtype."""
    B, Dx = x.shape
    Da = action.shape[1]
    Dk = Dx + Da
    H = params["w_fc"].shape[1]
    out_dim = params["w_mu"].shape[1]

    H_pad = _round_up(H, 128)            # lane-dense hidden
    P = _round_up(2 * out_dim, 128)      # lane-dense fused mu|sigma output slab
    wdt = jnp.bfloat16 if use_bf16 else jnp.float32

    # Packed bf16 activation: single fc matmul in the kernel; XLA fuses concat+cast into one pass
    # and the kernel's activation HBM read is half the f32 bytes.
    xa = jnp.concatenate([x, action], axis=1).astype(wdt)

    # One-time (per trace) weight prep: packed fc weight, fused mu|sigma head, zero-padded to
    # lane width (padded hidden lanes stay exactly zero -> LN sums stay correct).
    wfc = _pad2(params["w_fc"], Dk, H_pad).astype(wdt)
    bfc = _pad2(params["b_fc"], 1, H_pad)
    gam = _pad2(params["ln_gamma"], 1, H_pad)
    bet = _pad2(params["ln_beta"], 1, H_pad)
    wh = _pad2(jnp.concatenate([params["w_mu"], params["w_sigma"]], axis=1), H_pad, P).astype(wdt)
    bh = _pad2(jnp.concatenate([params["b_mu"], params["b_sigma"]], axis=1), 1, P)

    # Batch tile: large to amortize per-grid-step overhead, but at least 2 blocks when B > 16 so
    # the "parallel" batch axis can shard across v7x's two TensorCores.
    if B <= 16:
        tb = B
    else:
        tb = min(block_b, _round_up(pl.cdiv(B, 2), 8))
    grid = (pl.cdiv(B, tb),)

    batch_map = lambda i: (i, 0)   # activation / output blocks march over the batch
    fixed_map = lambda i: (0, 0)   # weights / biases stay VMEM-resident across the grid

    # Explicit scoped-VMEM budget: double-buffered streams + resident weights, generous headroom,
    # clamped to [16 MiB (>= v5e scoped default), 64 MiB (v7x physical)].
    e_in = 2 if use_bf16 else 4
    e_out = jnp.dtype(out_dtype).itemsize
    stream_bytes = 2 * tb * (Dk * e_in + P * e_out)
    weight_bytes = 2 * ((Dk * H_pad + H_pad * P) * e_in + (3 * H_pad + P) * 4)
    vmem_limit = int(min(max(2 * (stream_bytes + weight_bytes) + (4 << 20), 16 << 20), 64 << 20))

    kernel = functools.partial(_transition_kernel,
                               float(min_sigma), float(max_sigma), int(H), int(out_dim))

    out = pl.pallas_call(
        kernel,
        out_shape=jax.ShapeDtypeStruct((B, P), out_dtype),
        grid_spec=pltpu.PrefetchScalarGridSpec(
            num_scalar_prefetch=0,
            grid=grid,
            in_specs=[
                pl.BlockSpec((tb, Dk), batch_map),      # packed [x | action]
                pl.BlockSpec((Dk, H_pad), fixed_map),   # packed fc weight
                pl.BlockSpec((1, H_pad), fixed_map),    # b_fc
                pl.BlockSpec((1, H_pad), fixed_map),    # ln gamma
                pl.BlockSpec((1, H_pad), fixed_map),    # ln beta
                pl.BlockSpec((H_pad, P), fixed_map),    # fused mu|sigma weight
                pl.BlockSpec((1, P), fixed_map),        # fused mu|sigma bias
            ],
            out_specs=pl.BlockSpec((tb, P), batch_map),
        ),
        # Batch axis is embarrassingly parallel -> megacore sharding / v7x dual TC.
        compiler_params=pltpu.CompilerParams(dimension_semantics=("parallel",),
                                             vmem_limit_bytes=vmem_limit),
    )(xa, wfc, bfc, gam, bet, wh, bh)

    # If the consumer can take the packed (B, P) slab directly, these slices can be skipped.
    mu = out[:, :out_dim]
    sigma = out[:, out_dim:2 * out_dim]
    return mu, sigma


def _reference_forward(x, action, params, max_sigma=10.0, min_sigma=1e-4):
    """Pure-JAX f32 reference matching the PyTorch module."""
    xc = jnp.concatenate([x, action], axis=1)
    h = xc @ params["w_fc"] + params["b_fc"]
    mean = jnp.mean(h, axis=-1, keepdims=True)
    var = jnp.mean((h - mean) ** 2, axis=-1, keepdims=True)
    h = (h - mean) * jax.lax.rsqrt(var + 1e-5) * params["ln_gamma"] + params["ln_beta"]
    h = jnp.maximum(h, 0.0)
    mu = h @ params["w_mu"] + params["b_mu"]
    sigma = min_sigma + (max_sigma - min_sigma) * jax.nn.sigmoid(h @ params["w_sigma"] + params["b_sigma"])
    return mu, sigma


def _init_params(key, in_dim, hidden_dim, out_dim):
    """Deterministic synthetic init (shapes match nn.Linear / nn.LayerNorm)."""
    ks = jax.random.split(key, 6)

    def lin(kw, kb, fan_in, fan_out):
        bound = 1.0 / jnp.sqrt(fan_in)
        w = jax.random.uniform(kw, (fan_in, fan_out), jnp.float32, -bound, bound)
        b = jax.random.uniform(kb, (1, fan_out), jnp.float32, -bound, bound)
        return w, b

    w_fc, b_fc = lin(ks[0], ks[1], in_dim, hidden_dim)
    w_mu, b_mu = lin(ks[2], ks[3], hidden_dim, out_dim)
    w_sg, b_sg = lin(ks[4], ks[5], hidden_dim, out_dim)
    return {
        "w_fc": w_fc, "b_fc": b_fc,
        "ln_gamma": jnp.ones((1, hidden_dim), jnp.float32),
        "ln_beta": jnp.zeros((1, hidden_dim), jnp.float32),
        "w_mu": w_mu, "b_mu": b_mu,
        "w_sigma": w_sg, "b_sigma": b_sg,
    }


if __name__ == "__main__":
    # Module-consistent small shapes: projection.out_dim=32, action_shape=(4,), hidden_dim=32.
    B, OUT_DIM, ACT_DIM, HIDDEN = 2, 32, 4, 32

    key = jax.random.PRNGKey(0)
    k_x, k_a, k_p = jax.random.split(key, 3)
    x = jax.random.normal(k_x, (B, OUT_DIM), jnp.float32)
    action = jax.random.normal(k_a, (B, ACT_DIM), jnp.float32)
    params = _init_params(k_p, OUT_DIM + ACT_DIM, HIDDEN, OUT_DIM)

    mu, sigma = probabilistic_transition_forward(x, action, params)
    jax.block_until_ready((mu, sigma))

    assert mu.shape == (B, OUT_DIM) and sigma.shape == (B, OUT_DIM)
    mu32 = mu.astype(jnp.float32)
    sg32 = sigma.astype(jnp.float32)

    # Range sanity: tanh-form sigmoid is exactly bounded in f32; small slack covers bf16
    # rounding of the stored output.
    assert bool(jnp.all(sg32 >= 1e-4 - 1e-5)) and bool(jnp.all(sg32 <= 10.0 + 1e-3))

    # Numerical check against the f32 reference.  bf16 weights/activations in the MXU plus the
    # bf16 output slab introduce ~1e-2-level absolute differences (sigma is scaled by ~10,
    # hence the looser bound).
    mu_ref, sigma_ref = _reference_forward(x, action, params)
    assert float(jnp.max(jnp.abs(mu32 - mu_ref))) < 5e-2
    assert float(jnp.max(jnp.abs(sg32 - sigma_ref))) < 1e-1

    print("KERNEL_OK")
</pallas_src>

<mosaic_0001>
module attributes {stable_mosaic.version = 11 : i64} {
  func.func @_transition_kernel(%arg0: i32, %arg1: memref<2x36xbf16, #tpu.memory_space<vmem>>, %arg2: memref<36x128xbf16, #tpu.memory_space<vmem>>, %arg3: memref<1x128xf32, #tpu.memory_space<vmem>>, %arg4: memref<1x128xf32, #tpu.memory_space<vmem>>, %arg5: memref<1x128xf32, #tpu.memory_space<vmem>>, %arg6: memref<128x128xbf16, #tpu.memory_space<vmem>>, %arg7: memref<1x128xf32, #tpu.memory_space<vmem>>, %arg8: memref<2x128xbf16, #tpu.memory_space<vmem>>) attributes {dimension_semantics = [#tpu.dimension_semantics<parallel>], iteration_bounds = array<i64: 1>, scalar_prefetch = 0 : i64, scratch_operands = 0 : i64, tpu.core_type = #tpu.core_type<tc>, window_params = [{transform_indices = @transform_0, window_bounds = array<i64: 2, 36>}, {pipeline_mode = #tpu.pipeline_mode<synchronous>, transform_indices = @transform_1, window_bounds = array<i64: 36, 128>}, {pipeline_mode = #tpu.pipeline_mode<synchronous>, transform_indices = @transform_2, window_bounds = array<i64: 1, 128>}, {pipeline_mode = #tpu.pipeline_mode<synchronous>, transform_indices = @transform_3, window_bounds = array<i64: 1, 128>}, {pipeline_mode = #tpu.pipeline_mode<synchronous>, transform_indices = @transform_4, window_bounds = array<i64: 1, 128>}, {pipeline_mode = #tpu.pipeline_mode<synchronous>, transform_indices = @transform_5, window_bounds = array<i64: 128, 128>}, {pipeline_mode = #tpu.pipeline_mode<synchronous>, transform_indices = @transform_6, window_bounds = array<i64: 1, 128>}, {transform_indices = @transform_7, window_bounds = array<i64: 2, 128>}]} {
    %c0 = arith.constant 0 : index
    %c0_0 = arith.constant 0 : index
    %0 = vector.load %arg1[%c0, %c0_0] : memref<2x36xbf16, #tpu.memory_space<vmem>>, vector<2x36xbf16>
    %c0_1 = arith.constant 0 : index
    %c0_2 = arith.constant 0 : index
    %1 = vector.load %arg2[%c0_1, %c0_2] : memref<36x128xbf16, #tpu.memory_space<vmem>>, vector<36x128xbf16>
    %cst = arith.constant dense<0.000000e+00> : vector<2x128xf32>
    %2 = tpu.matmul %0, %1, %cst {dimension_numbers = #tpu.dot_dimension_numbers<[1], [0], [0], [1], [0, 0, 1, 1], [], []>} : vector<2x36xbf16>, vector<36x128xbf16>, vector<2x128xf32> -> vector<2x128xf32>
    %c0_3 = arith.constant 0 : index
    %c0_4 = arith.constant 0 : index
    %3 = vector.load %arg3[%c0_3, %c0_4] : memref<1x128xf32, #tpu.memory_space<vmem>>, vector<1x128xf32>
    %4 = vector.broadcast %3 : vector<1x128xf32> to vector<2x128xf32>
    %5 = arith.addf %2, %4 : vector<2x128xf32>
    %6 = tpu.iota {dimensions = array<i32: 1>} : vector<2x128xi32>
    %cst_5 = arith.constant dense<0.000000e+00> : vector<2xf32>
    %7 = vector.multi_reduction <add>, %5, %cst_5 [1] : vector<2x128xf32> to vector<2xf32>
    %8 = vector.shape_cast %7 : vector<2xf32> to vector<2x1xf32>
    %cst_6 = arith.constant 3.125000e-02 : f32
    %9 = vector.broadcast %cst_6 : f32 to vector<2x1xf32>
    %10 = arith.mulf %8, %9 : vector<2x1xf32>
    %c32_i32 = arith.constant 32 : i32
    %11 = vector.broadcast %c32_i32 : i32 to vector<2x128xi32>
    %12 = arith.cmpi slt, %6, %11 : vector<2x128xi32>
    %13 = vector.broadcast %10 : vector<2x1xf32> to vector<2x128xf32>
    %14 = arith.subf %5, %13 : vector<2x128xf32>
    %cst_7 = arith.constant 0.000000e+00 : f32
    %15 = vector.broadcast %cst_7 : f32 to vector<2x128xf32>
    %16 = arith.select %12, %14, %15 : vector<2x128xi1>, vector<2x128xf32>
    %17 = arith.mulf %16, %16 : vector<2x128xf32>
    %cst_8 = arith.constant dense<0.000000e+00> : vector<2xf32>
    %18 = vector.multi_reduction <add>, %17, %cst_8 [1] : vector<2x128xf32> to vector<2xf32>
    %19 = vector.shape_cast %18 : vector<2xf32> to vector<2x1xf32>
    %cst_9 = arith.constant 3.125000e-02 : f32
    %20 = vector.broadcast %cst_9 : f32 to vector<2x1xf32>
    %21 = arith.mulf %19, %20 : vector<2x1xf32>
    %cst_10 = arith.constant 9.99999974E-6 : f32
    %22 = vector.broadcast %cst_10 : f32 to vector<2x1xf32>
    %23 = arith.addf %21, %22 : vector<2x1xf32>
    %24 = math.rsqrt %23 : vector<2x1xf32>
    %25 = vector.broadcast %24 : vector<2x1xf32> to vector<2x128xf32>
    %26 = arith.mulf %16, %25 : vector<2x128xf32>
    %c0_11 = arith.constant 0 : index
    %c0_12 = arith.constant 0 : index
    %27 = vector.load %arg4[%c0_11, %c0_12] : memref<1x128xf32, #tpu.memory_space<vmem>>, vector<1x128xf32>
    %28 = vector.broadcast %27 : vector<1x128xf32> to vector<2x128xf32>
    %29 = arith.mulf %26, %28 : vector<2x128xf32>
    %c0_13 = arith.constant 0 : index
    %c0_14 = arith.constant 0 : index
    %30 = vector.load %arg5[%c0_13, %c0_14] : memref<1x128xf32, #tpu.memory_space<vmem>>, vector<1x128xf32>
    %31 = vector.broadcast %30 : vector<1x128xf32> to vector<2x128xf32>
    %32 = arith.addf %29, %31 : vector<2x128xf32>
    %cst_15 = arith.constant 0.000000e+00 : f32
    %33 = vector.broadcast %cst_15 : f32 to vector<2x128xf32>
    %34 = arith.maximumf %32, %33 : vector<2x128xf32>
    %35 = arith.truncf %34 : vector<2x128xf32> to vector<2x128xbf16>
    %c0_16 = arith.constant 0 : index
    %c0_17 = arith.constant 0 : index
    %36 = vector.load %arg6[%c0_16, %c0_17] : memref<128x128xbf16, #tpu.memory_space<vmem>>, vector<128x128xbf16>
    %cst_18 = arith.constant dense<0.000000e+00> : vector<2x128xf32>
    %37 = tpu.matmul %35, %36, %cst_18 {dimension_numbers = #tpu.dot_dimension_numbers<[1], [0], [0], [1], [0, 0, 1, 1], [], []>} : vector<2x128xbf16>, vector<128x128xbf16>, vector<2x128xf32> -> vector<2x128xf32>
    %c0_19 = arith.constant 0 : index
    %c0_20 = arith.constant 0 : index
    %38 = vector.load %arg7[%c0_19, %c0_20] : memref<1x128xf32, #tpu.memory_space<vmem>>, vector<1x128xf32>
    %39 = vector.broadcast %38 : vector<1x128xf32> to vector<2x128xf32>
    %40 = arith.addf %37, %39 : vector<2x128xf32>
    %cst_21 = arith.constant 5.000000e-01 : f32
    %41 = vector.broadcast %cst_21 : f32 to vector<2x128xf32>
    %42 = arith.mulf %41, %40 : vector<2x128xf32>
    %43 = math.tanh %42 : vector<2x128xf32>
    %cst_22 = arith.constant 1.000000e+00 : f32
    %44 = vector.broadcast %cst_22 : f32 to vector<2x128xf32>
    %45 = arith.addf %43, %44 : vector<2x128xf32>
    %cst_23 = arith.constant 5.000000e-01 : f32
    %46 = vector.broadcast %cst_23 : f32 to vector<2x128xf32>
    %47 = arith.mulf %46, %45 : vector<2x128xf32>
    %cst_24 = arith.constant 9.99989986 : f32
    %48 = vector.broadcast %cst_24 : f32 to vector<2x128xf32>
    %49 = arith.mulf %48, %47 : vector<2x128xf32>
    %cst_25 = arith.constant 9.99999974E-5 : f32
    %50 = vector.broadcast %cst_25 : f32 to vector<2x128xf32>
    %51 = arith.addf %50, %49 : vector<2x128xf32>
    %52 = tpu.iota {dimensions = array<i32: 1>} : vector<2x128xi32>
    %c32_i32_26 = arith.constant 32 : i32
    %53 = vector.broadcast %c32_i32_26 : i32 to vector<2x128xi32>
    %54 = arith.cmpi slt, %52, %53 : vector<2x128xi32>
    %55 = arith.select %54, %40, %51 : vector<2x128xi1>, vector<2x128xf32>
    %56 = arith.truncf %55 : vector<2x128xf32> to vector<2x128xbf16>
    %c0_27 = arith.constant 0 : index
    %c0_28 = arith.constant 0 : index
    %57 = vector.load %arg8[%c0_27, %c0_28] : memref<2x128xbf16, #tpu.memory_space<vmem>>, vector<2x128xbf16>
    tpu.vector_store %arg8[%c0_27, %c0_28], %56 {strides = array<i32>} : memref<2x128xbf16, #tpu.memory_space<vmem>>, vector<2x128xbf16>,
    return
  }
  func.func @transform_0(%arg0: i32) -> (i32, i32) {
    %c0_i32 = arith.constant 0 : i32
    %c0_i32_0 = arith.constant 0 : i32
    return %arg0, %c0_i32 : i32, i32
  }
  func.func @transform_1(%arg0: i32) -> (i32, i32) {
    %c0_i32 = arith.constant 0 : i32
    %c0_i32_0 = arith.constant 0 : i32
    %c0_i32_1 = arith.constant 0 : i32
    return %c0_i32, %c0_i32_0 : i32, i32
  }
  func.func @transform_2(%arg0: i32) -> (i32, i32) {
    %c0_i32 = arith.constant 0 : i32
    %c0_i32_0 = arith.constant 0 : i32
    %c0_i32_1 = arith.constant 0 : i32
    return %c0_i32, %c0_i32_0 : i32, i32
  }
  func.func @transform_3(%arg0: i32) -> (i32, i32) {
    %c0_i32 = arith.constant 0 : i32
    %c0_i32_0 = arith.constant 0 : i32
    %c0_i32_1 = arith.constant 0 : i32
    return %c0_i32, %c0_i32_0 : i32, i32
  }
  func.func @transform_4(%arg0: i32) -> (i32, i32) {
    %c0_i32 = arith.constant 0 : i32
    %c0_i32_0 = arith.constant 0 : i32
    %c0_i32_1 = arith.constant 0 : i32
    return %c0_i32, %c0_i32_0 : i32, i32
  }
  func.func @transform_5(%arg0: i32) -> (i32, i32) {
    %c0_i32 = arith.constant 0 : i32
    %c0_i32_0 = arith.constant 0 : i32
    %c0_i32_1 = arith.constant 0 : i32
    return %c0_i32, %c0_i32_0 : i32, i32
  }
  func.func @transform_6(%arg0: i32) -> (i32, i32) {
    %c0_i32 = arith.constant 0 : i32
    %c0_i32_0 = arith.constant 0 : i32
    %c0_i32_1 = arith.constant 0 : i32
    return %c0_i32, %c0_i32_0 : i32, i32
  }
  func.func @transform_7(%arg0: i32) -> (i32, i32) {
    %c0_i32 = arith.constant 0 : i32
    %c0_i32_0 = arith.constant 0 : i32
    return %arg0, %c0_i32 : i32, i32
  }
}

</mosaic_0001>

<bundles_post_ra>
// kernel: tpu_custom_call.1
= control target key start
LH: loop header
LB: loop body
LE: loop exit
PB: predicated region body
PF: predicated region fallthrough
CT: control target
= control target key end

     0   :  { %12 = vsyncpa [#allocation3], 0  ;;  %s512_s0 = inlined_call_operand.hbm [shape: bf16[2,36], index: 0, kind: input, shape index: {}]   ;;  %s513_s1 = inlined_call_operand.hbm [shape: bf16[36,128], index: 1, kind: input, shape index: {}]   ;;  %s514_s2 = inlined_call_operand.vmem [shape: f32[1,128], index: 2, kind: input, shape index: {}]   ;;  %s515_s3 = inlined_call_operand.vmem [shape: f32[1,128], index: 3, kind: input, shape index: {}]   ;;  %s516_s4 = inlined_call_operand.vmem [shape: f32[1,128], index: 4, kind: input, shape index: {}]   ;;  %s517_s5 = inlined_call_operand.hbm [shape: bf16[128,128], index: 5, kind: input, shape index: {}]   ;;  %s518_s6 = inlined_call_operand.vmem [shape: f32[1,128], index: 6, kind: input, shape index: {}]   ;;  %s519_s7 = inlined_call_operand.hbm [shape: bf16[2,128], index: 7, kind: output, shape index: {}]  }
   0x1   :  { %13 = vsyncpa [#allocation6], 0  ;;  %s30_s26 = sshll.u32 %s513_s1, 4  ;;  %s31_s26 = int_to_ptr.hbm [resolvable:$true] %s30_s26 }
   0x2   :  { %14 = vsyncpa [#allocation4], 0  ;;  %s432_s27 = smov [#allocation5]   ;;  %s20_s8 = sshll.u32 %s512_s0, 4  ;;  %s21_s8 = int_to_ptr.hbm [resolvable:$true] %s20_s8 }
   0x3   :  { %s32_s28 = sshll.u32 %s432_s27, 4  ;;  %s433_s9 = smov 64   ;;  %s33_s28 = int_to_ptr.vmem [resolvable:$true] %s32_s28 }
   0x4   :  { %s434_s10 = smov 4   ;;  %s435_s11 = smov [#allocation2]  }
   0x5   :  { %38 = dma.hbm_to_vmem [thread:$0]  %s31_s26, 320, %s33_s28, [#allocation6], %s433_s9, %s433_s9, %s434_s10  }
   0x6   :  { %s22_s12 = sshll.u32 %s435_s11, 4  ;;  %s49_s15 = sshll.u32 %s517_s5, 4  ;;  %s23_s12 = int_to_ptr.vmem [resolvable:$true] %s22_s12  ;;  %s50_s15 = int_to_ptr.hbm [resolvable:$true] %s49_s15 }
   0x7   :  { %25 = dma.hbm_to_vmem [thread:$0]  %s21_s8, 16, %s23_s12, [#allocation3]  }
   0x8   :  { %s436_s1 = smov [#allocation7]  }
   0x9   :  { %s51_s16 = sshll.u32 %s436_s1, 4  ;;  %s52_s16 = int_to_ptr.vmem [resolvable:$true] %s51_s16 }
   0xa   :  { %57 = dma.hbm_to_vmem [thread:$0]  %s50_s15, 1024, %s52_s16, [#allocation6], %s433_s9, %s433_s9, %s434_s10  }
   0xb   :  { %426 = dma.done.wait [#allocation3], 16  }
   0xc   :  { %427 = vsyncadd [#allocation3], 4294967280 }
   0xd   :  { %428 = dma.done.wait [#allocation6], 1344  }
   0xe   :  { %429 = vsyncadd [#allocation6], 4294965952  ;;  %v78_v0 = vld [vmem:[#allocation5 + $0x10] sm:$0x3]  ;;  %vm102_vm0 = vcmask 1041408   ;;  %v307_v4 = vld [vmem:[#allocation5 + $0x8] sm:$0xff]  ;;  %v119_v12 = vlaneseq }
   0xf   :  { %v92_v1 = vunpack.c.l.b16 %v78_v0  ;;  %v306_v5 = vld [vmem:[#allocation5] sm:$0xff]  ;;  %v73_v6 = vld [vmem:[#allocation2] sm:$0x1]  ;;  %vm98_vm1 = vcmask 293888   ;;  %v315_v20 = vld [vmem:[#allocation7 + $0x38] sm:$0xff]  ;;  %s254_s24 = sshll.u32 %s519_s7, 4  ;;  %s255_s24 = int_to_ptr.hbm [resolvable:$true] %s254_s24 }
  0x10   :  { %v322_v7 = vld [vmem:[%s514_s2] ss:$0 sm:$0xff]  ;;  %v492_v13 = vand.u32 127, %v119_v12  ;;  %225 = vmatpush.bf16.msra.mxu1 %v315_v20  ;;  %v314_v21 = vld [vmem:[#allocation7 + $0x30] sm:$0xff]  ;;  %v312_v23 = vld [vmem:[#allocation7 + $0x20] sm:$0xff] }
  0x11   :  { %v95_v2 = vpack.c.b16 %v92_v1, %v92_v1  ;;  %v313_v22 = vld [vmem:[#allocation7 + $0x28] sm:$0xff]  ;;  %v311_v24 = vld [vmem:[#allocation7 + $0x18] sm:$0xff]  ;;  %v310_v25 = vld [vmem:[#allocation7 + $0x10] sm:$0xff] }
  0x12   :  { %vm125_vm2 = vcmp.lt.s32.totalorder %v492_v13, 32  ;;  %v309_v26 = vld [vmem:[#allocation7 + $0x8] sm:$0xff]  ;;  %v308_v27 = vld [vmem:[#allocation7] sm:$0xff] }
  0x13   :  { %v104_v3 = vsel %vm102_vm0, %v95_v2, 0  ;;  %v323_v37 = vld [vmem:[%s515_s3] ss:$0 sm:$0xff]  ;;  %s437_s3 = smov [#allocation8]  }
  0x14   :  { %111 = vmatpush.bf16.msra.mxu0 %v104_v3  ;;  %226 = vmatpush.bf16.msra.mxu1 %v314_v21  ;;  %v324_v40 = vld [vmem:[%s516_s4] ss:$0 sm:$0xff]  ;;  %s252_s4 = sshll.u32 %s437_s3, 4  ;;  %s253_s4 = int_to_ptr.vmem [resolvable:$true] %s252_s4 }
  0x15   :  { %v325_v45 = vld [vmem:[%s518_s6] ss:$0 sm:$0xff] }
  0x18   :  { %112 = vmatpush.bf16.msra.mxu0 %v307_v4  ;;  %227 = vmatpush.bf16.msra.mxu1 %v313_v22 }
  0x1c   :  { %113 = vmatpush.bf16.msra.mxu0 %v306_v5  ;;  %228 = vmatpush.bf16.msra.mxu1 %v312_v23 }
  0x1f   :  { %273 = vmatmul.msk.bf16.vlgmr.msra.gmra.mxu0 %vm98_vm1, %v73_v6 }
  0x20   :  { %229 = vmatpush.bf16.msra.mxu1 %v311_v24 }
  0x24   :  { %230 = vmatpush.bf16.msra.mxu1 %v310_v25 }
  0x28   :  { %231 = vmatpush.bf16.msra.mxu1 %v309_v26 }
  0x2c   :  { %232 = vmatpush.bf16.msra.mxu1 %v308_v27 }
  0x9c   :  { %v115_v8 = vpop.f32.mrf.mxu0 }
  0x9d   :  { %v116_v9 = vadd.f32 %v322_v7, %v115_v8 }
  0x9f   :  { %v121_v10 = vsel %vm102_vm0, %v116_v9, 0.0 }
  0xa0   :  { %122 = vadd.xlane.f32.xlu0 %v121_v10 }
  0xa4   :  { %v117_v11 = vpop.f32.mrf.mxu0 }
 0x113   :  { %v123_v14 = vpop.xlane.xlu0 %122 }
 0x114   :  { %v124_v15 = vmul.f32 0.03125, %v123_v14 }
 0x116   :  { %v126_v16 = vsub.f32 %v116_v9, %v124_v15 }
 0x118   :  { %v127_v17 = vsel %vm125_vm2, %v126_v16, 0.0 }
 0x119   :  { %v128_v18 = vmul.f32 %v127_v17, %v127_v17 }
 0x11b   :  { %v129_v19 = vsel %vm102_vm0, %v128_v18, 0.0 }
 0x11c   :  { %130 = vadd.xlane.f32.xlu0 %v129_v19 }
 0x18f   :  { %v131_v28 = vpop.xlane.xlu0 %130 }
 0x190   :  { %v132_v29 = vmul.f32 0.03125, %v131_v28 }
 0x192   :  { %v133_v30 = vadd.f32 1e-05, %v132_v29 }
 0x194   :  { %326 = vrsqrt.f32 %v133_v30  ;;  %vm140_vm4 = vweird.f32 %v133_v30 }
 0x19a   :  { %v327_v31 = vpop.eup %326 }
 0x19b   :  { %v135_v32 = vmul.f32 %v327_v31, %v133_v30  ;;  %vm141_vm3 = vweird.f32 %v327_v31 }
 0x19c   :  { %vm142_vm5 = vmor %vm140_vm4, %vm141_vm3 }
 0x19d   :  { %v136_v33 = vmul.f32 %v327_v31, %v135_v32 }
 0x19f   :  { %v137_v34 = vmul.f32 0.5, %v136_v33 }
 0x1a1   :  { %v138_v35 = vsub.f32 1.5, %v137_v34 }
 0x1a3   :  { %v139_v36 = vmul.f32 %v327_v31, %v138_v35 }
 0x1a5   :  { %v143_v38 = vsel %vm142_vm5, %v327_v31, %v139_v36 }
 0x1a6   :  { %v144_v39 = vmul.f32 %v143_v38, %v127_v17 }
 0x1a8   :  { %v149_v41 = vmul.f32 %v323_v37, %v144_v39 }
 0x1aa   :  { %v154_v42 = vadd.f32 %v324_v40, %v149_v41 }
 0x1ac   :  { %v155_v43 = vmax.f32 %v154_v42, 0.0 }
 0x1ae   :  { %v156_v44 = vpack.c.bf16 %v155_v43, %v155_v43 }
 0x1b0   :  { %233 = vmatmul.bf16.vlgmr.msra.gmra.mxu1 %v156_v44 }
 0x22d   :  { %v234_v46 = vpop.f32.mrf.mxu1 }
 0x22e   :  { %v235_v47 = vadd.f32 %v325_v45, %v234_v46 }
 0x230   :  { %v238_v48 = vmul.f32 0.5, %v235_v47 }
 0x232   :  { %328 = vtanh.f32 %v238_v48 }
 0x235   :  { %v236_v49 = vpop.f32.mrf.mxu1 }
 0x238   :  { %v329_v50 = vpop.eup %328 }
 0x239   :  { %v240_v51 = vadd.f32 1.0, %v329_v50 }
 0x23b   :  { %v241_v52 = vmul.f32 0.5, %v240_v51 }
 0x23d   :  { %v242_v53 = vmul.f32 9.9999, %v241_v52 }
 0x23f   :  { %v243_v54 = vadd.f32 0.0001, %v242_v53 }
 0x241   :  { %v244_v55 = vsel %vm125_vm2, %v235_v47, %v243_v54 }
 0x242   :  { %v245_v56 = vpack.c.bf16 %v244_v55, %v244_v55 }
 0x244   :  { %246 = vst [vmem:[#allocation8] sm:$0x1] %v245_v56 }
 0x245   :  { %257 = dma.vmem_to_hbm [thread:$0]  %s253_s4, 16, %s255_s24, [#allocation4]  }
 0x246   :  { %430 = dma.done.wait [#allocation4], 16  }
 0x247   :  { %431 = vsyncadd [#allocation4], 4294967280 }
 0x248   :  { %262 = vsyncpa [#allocation3], 1 }
 0x249   :  { %263 = vsyncpa [#allocation6], 1 }
 0x24a   :  { %264 = vsyncpa [#allocation4], 1 }

</bundles_post_ra>
